<compile_context>
chip_gen: v5e
topology: v5e:2x2
jax: 0.10.0
libtpu: 0.0.40
codegen_flags: <defaults>
</compile_context>

<pallas_src>
import jax
import jax.numpy as jnp
from jax.experimental import pallas as pl
from jax.experimental.pallas import tpu as pltpu


def _round_up(x, m):
    return ((x + m - 1) // m) * m


def _cdiv(a, b):
    return (a + b - 1) // b


def _vmem_budget_bytes():
    """(tile-footprint budget, scoped vmem limit) sized per TPU generation."""
    cap = 64 << 20  # conservative fallback = v7x physical VMEM per TensorCore
    try:
        info = pltpu.get_tpu_info()
        cap = int(getattr(info, "vmem_capacity_bytes", cap))
    except Exception:
        pass
    budget = min(int(cap * 0.60), 96 << 20)   # ~38 MiB on v7x, ~77 MiB on v5e/v6e
    limit = min(int(cap * 0.75), 112 << 20)   # ~48 MiB on v7x, ~96 MiB on v5e/v6e
    return budget, limit


def _linear_fast_kernel(x_ref, w_ref, b_ref, o_ref):
    # x: [tn, dim_in], w: [dim_in, tdo], b: [1, tdo] (f32), o: [tn, tdo]
    x = x_ref[...]
    w = w_ref[...]
    if x.dtype != w.dtype:
        x = x.astype(w.dtype)          # per-tile cast; hides under MXU slack
    acc = jnp.dot(x, w, preferred_element_type=jnp.float32)
    o_ref[...] = (acc + b_ref[...]).astype(o_ref.dtype)


def _linear_acc_kernel(x_ref, w_ref, b_ref, o_ref, acc_ref):
    # x: [tn, tk], w: [tk, tdo], b: [1, tdo] (f32), o: [tn, tdo], acc: [tn, tdo] f32
    k = pl.program_id(2)
    x = x_ref[...]
    w = w_ref[...]
    if x.dtype != w.dtype:
        x = x.astype(w.dtype)
    prod = jnp.dot(x, w, preferred_element_type=jnp.float32)

    @pl.when(k == 0)
    def _():
        acc_ref[...] = prod            # dot-init: no zero-fill round trip

    @pl.when(k != 0)
    def _():
        acc_ref[...] = acc_ref[...] + prod

    @pl.when(k == pl.num_programs(2) - 1)
    def _():
        o_ref[...] = (acc_ref[...] + b_ref[...]).astype(o_ref.dtype)


def _pick_row_tile(n_rows, per_row_bytes, row_budget, row_align, want_two_blocks,
                   cap=4096):
    if n_rows <= row_align:
        return n_rows                  # full-extent row block, no alignment needed
    n_up = _round_up(n_rows, row_align)
    tn = row_budget // max(per_row_bytes, 1)
    tn = min(cap, tn, n_up)
    tn = max(row_align, (tn // row_align) * row_align)
    if want_two_blocks and tn >= n_up and n_rows > 2 * row_align:
        # Keep >= 2 row blocks so both TensorCores (v7x) get work.
        tn = _round_up(_cdiv(n_rows, 2), row_align)
    return tn


def node_apply_forward(h, weight_t, bias):
    """h: [N, dim_in]; weight_t: [dim_in, dim_out] (pre-transposed); bias: [dim_out]."""
    N, dim_in = h.shape
    k_dim, dim_out = weight_t.shape
    assert k_dim == dim_in, (k_dim, dim_in)
    out_dtype = h.dtype

    x_item = jnp.dtype(h.dtype).itemsize
    w_item = jnp.dtype(weight_t.dtype).itemsize
    o_item = jnp.dtype(out_dtype).itemsize
    row_align = 8 if w_item >= 4 else 16   # sub-32-bit compute packs rows per sublane

    budget, vmem_limit = _vmem_budget_bytes()

    # Lane-dense output: pad out-features (weight / bias only -- tiny) to a 128 mult.
    dout_p = _round_up(dim_out, 128)
    if dout_p != dim_out:
        weight_t = jnp.pad(weight_t, ((0, 0), (0, dout_p - dim_out)))
        bias = jnp.pad(bias, (0, dout_p - dim_out))
    b2d = bias.astype(jnp.float32).reshape(1, dout_p)

    cost = pl.CostEstimate(
        flops=2 * N * dim_in * dout_p,
        transcendentals=0,
        bytes_accessed=(N * dim_in * x_item + dim_in * dout_p * w_item
                        + N * dout_p * o_item),
    )

    if dim_in <= 2048:
        # -------- fast path: no K axis, no accumulator, weight resident in VMEM -----
        # Largest 128-multiple tdo dividing dout_p that still leaves room for >=256
        # rows per step (prefer tdo == dout_p so activations are read once).
        tdo = dout_p
        while tdo > 128:
            if dout_p % tdo == 0:
                fixed = 2 * dim_in * tdo * w_item
                if fixed + 256 * 2 * (dim_in * x_item + tdo * o_item) <= budget:
                    break
            tdo -= 128

        fixed = 2 * dim_in * tdo * w_item                 # weight panel (x2 buffers)
        per_row = 2 * (dim_in * x_item + tdo * o_item)
        row_budget = max(budget - fixed, per_row * row_align)
        tn = _pick_row_tile(N, per_row, row_budget, row_align,
                            want_two_blocks=(dout_p == tdo))
        grid = (_cdiv(N, tn), dout_p // tdo)

        out = pl.pallas_call(
            _linear_fast_kernel,
            out_shape=jax.ShapeDtypeStruct((N, dout_p), out_dtype),
            grid_spec=pltpu.PrefetchScalarGridSpec(
                num_scalar_prefetch=0,
                grid=grid,
                in_specs=[
                    pl.BlockSpec((tn, dim_in), lambda i, j: (i, 0)),
                    pl.BlockSpec((dim_in, tdo), lambda i, j: (0, j)),
                    pl.BlockSpec((1, tdo), lambda i, j: (0, j)),
                ],
                out_specs=pl.BlockSpec((tn, tdo), lambda i, j: (i, j)),
            ),
            compiler_params=pltpu.CompilerParams(
                dimension_semantics=("parallel", "parallel"),
                vmem_limit_bytes=vmem_limit,
            ),
            cost_estimate=cost,
        )(h, weight_t, b2d)
    else:
        # -------- general path: K-tiled with f32 accumulator (rare for GNN dims) ----
        tk = 512
        din_p = _round_up(dim_in, tk)
        if din_p != dim_in:
            # Zero K-padding of BOTH operands (garbage-K x zero-weight could be NaN*0).
            h = jnp.pad(h, ((0, 0), (0, din_p - dim_in)))
            weight_t = jnp.pad(weight_t, ((0, din_p - dim_in), (0, 0)))

        tdo = 128
        cand = min(dout_p, 512)
        while cand >= 128:
            if dout_p % cand == 0:
                tdo = cand
                break
            cand -= 128

        per_row = 2 * (tk * x_item + tdo * o_item) + tdo * 4   # + acc scratch
        fixed = 2 * tk * tdo * w_item
        row_budget = max(budget - fixed, per_row * row_align)
        tn = _pick_row_tile(N, per_row, row_budget, row_align,
                            want_two_blocks=False, cap=2048)
        grid = (_cdiv(N, tn), dout_p // tdo, din_p // tk)

        out = pl.pallas_call(
            _linear_acc_kernel,
            out_shape=jax.ShapeDtypeStruct((N, dout_p), out_dtype),
            grid_spec=pltpu.PrefetchScalarGridSpec(
                num_scalar_prefetch=0,
                grid=grid,
                in_specs=[
                    pl.BlockSpec((tn, tk), lambda i, j, k: (i, k)),
                    pl.BlockSpec((tk, tdo), lambda i, j, k: (k, j)),
                    pl.BlockSpec((1, tdo), lambda i, j, k: (0, j)),
                ],
                out_specs=pl.BlockSpec((tn, tdo), lambda i, j, k: (i, j)),
                scratch_shapes=[pltpu.VMEM((tn, tdo), jnp.float32)],
            ),
            compiler_params=pltpu.CompilerParams(
                dimension_semantics=("parallel", "parallel", "arbitrary"),
                vmem_limit_bytes=vmem_limit,
            ),
            cost_estimate=cost,
        )(h, weight_t, b2d)

    if dout_p != dim_out:
        out = out[:, :dim_out]
    return out


class NodeApplyModule:
    """JAX/Pallas port of the PyTorch NodeApplyModule (a single nn.Linear)."""

    def __init__(self, dim_in, dim_out, key, compute_dtype=None):
        kw, kb = jax.random.split(key)
        bound = 1.0 / (dim_in ** 0.5)
        # nn.Linear stores [dim_out, dim_in]; keep it pre-transposed to
        # [dim_in, dim_out] so the forward never pays for a transpose.
        w = jax.random.uniform(
            kw, (dim_out, dim_in), minval=-bound, maxval=bound, dtype=jnp.float32)
        weight_t = w.T
        if compute_dtype is not None:
            weight_t = weight_t.astype(compute_dtype)   # one-time cast at init
        self.weight_t = weight_t
        self.bias = jax.random.uniform(
            kb, (dim_out,), minval=-bound, maxval=bound, dtype=jnp.float32)

    def forward(self, node):
        h = node_apply_forward(node["data"]["h"], self.weight_t, self.bias)
        return {"h": h}


if __name__ == "__main__":
    key = jax.random.PRNGKey(0)
    k1, k2, k3, k4, k5, k6 = jax.random.split(key, 6)

    # --- case 1: tiny toy shapes (matches the original demo) ---------------------
    N, din, dout = 8, 32, 32
    m1 = NodeApplyModule(din, dout, k1)
    h1 = jax.random.normal(k2, (N, din), dtype=jnp.float32)
    o1 = jax.block_until_ready(m1.forward({"data": {"h": h1}})["h"])
    ref1 = h1 @ m1.weight_t + m1.bias
    assert o1.shape == (N, dout)
    assert jnp.allclose(o1, ref1, atol=1e-5, rtol=1e-5), \
        float(jnp.max(jnp.abs(o1 - ref1)))

    # --- case 2: ragged N, non-128 dims (ragged tail + out padding + 2-row grid) --
    N2, din2, dout2 = 300, 96, 160
    m2 = NodeApplyModule(din2, dout2, k3)
    h2 = jax.random.normal(k4, (N2, din2), dtype=jnp.float32)
    o2 = jax.block_until_ready(m2.forward({"data": {"h": h2}})["h"])
    ref2 = h2 @ m2.weight_t + m2.bias
    assert o2.shape == (N2, dout2)
    assert jnp.allclose(o2, ref2, atol=1e-4, rtol=1e-4), \
        float(jnp.max(jnp.abs(o2 - ref2)))

    # --- case 3: bf16 weight at init, in-kernel activation cast, f32 accumulate ---
    N3, din3, dout3 = 64, 128, 128
    m3 = NodeApplyModule(din3, dout3, k5, compute_dtype=jnp.bfloat16)
    h3 = jax.random.normal(k6, (N3, din3), dtype=jnp.float32)
    o3 = jax.block_until_ready(m3.forward({"data": {"h": h3}})["h"])
    ref3 = h3 @ m3.weight_t.astype(jnp.float32) + m3.bias
    assert o3.shape == (N3, dout3)
    assert jnp.allclose(o3, ref3, atol=5e-2, rtol=5e-2), \
        float(jnp.max(jnp.abs(o3 - ref3)))

    print("KERNEL_OK")
</pallas_src>

<mosaic_0001>
module attributes {stable_mosaic.version = 11 : i64} {
  func.func @_linear_fast_kernel(%arg0: i32, %arg1: i32, %arg2: memref<8x32xf32, #tpu.memory_space<vmem>>, %arg3: memref<32x128xf32, #tpu.memory_space<vmem>>, %arg4: memref<1x128xf32, #tpu.memory_space<vmem>>, %arg5: memref<8x128xf32, #tpu.memory_space<vmem>>) attributes {dimension_semantics = [#tpu.dimension_semantics<parallel>, #tpu.dimension_semantics<parallel>], iteration_bounds = array<i64: 1, 1>, scalar_prefetch = 0 : i64, scratch_operands = 0 : i64, tpu.core_type = #tpu.core_type<tc>, window_params = [{transform_indices = @transform_0, window_bounds = array<i64: 8, 32>}, {transform_indices = @transform_1, window_bounds = array<i64: 32, 128>}, {transform_indices = @transform_2, window_bounds = array<i64: 1, 128>}, {transform_indices = @transform_3, window_bounds = array<i64: 8, 128>}]} {
    %c0 = arith.constant 0 : index
    %c0_0 = arith.constant 0 : index
    %0 = vector.load %arg2[%c0, %c0_0] : memref<8x32xf32, #tpu.memory_space<vmem>>, vector<8x32xf32>
    %c0_1 = arith.constant 0 : index
    %c0_2 = arith.constant 0 : index
    %1 = vector.load %arg3[%c0_1, %c0_2] : memref<32x128xf32, #tpu.memory_space<vmem>>, vector<32x128xf32>
    %cst = arith.constant dense<0.000000e+00> : vector<8x128xf32>
    %2 = tpu.matmul %0, %1, %cst {dimension_numbers = #tpu.dot_dimension_numbers<[1], [0], [0], [1], [0, 0, 1, 1], [], []>} : vector<8x32xf32>, vector<32x128xf32>, vector<8x128xf32> -> vector<8x128xf32>
    %c0_3 = arith.constant 0 : index
    %c0_4 = arith.constant 0 : index
    %3 = vector.load %arg4[%c0_3, %c0_4] : memref<1x128xf32, #tpu.memory_space<vmem>>, vector<1x128xf32>
    %4 = vector.broadcast %3 : vector<1x128xf32> to vector<8x128xf32>
    %5 = arith.addf %2, %4 : vector<8x128xf32>
    %c0_5 = arith.constant 0 : index
    %c0_6 = arith.constant 0 : index
    %6 = vector.load %arg5[%c0_5, %c0_6] : memref<8x128xf32, #tpu.memory_space<vmem>>, vector<8x128xf32>
    tpu.vector_store %arg5[%c0_5, %c0_6], %5 {strides = array<i32>} : memref<8x128xf32, #tpu.memory_space<vmem>>, vector<8x128xf32>,
    return
  }
  func.func @transform_0(%arg0: i32, %arg1: i32) -> (i32, i32) {
    %c0_i32 = arith.constant 0 : i32
    %c0_i32_0 = arith.constant 0 : i32
    return %arg0, %c0_i32 : i32, i32
  }
  func.func @transform_1(%arg0: i32, %arg1: i32) -> (i32, i32) {
    %c0_i32 = arith.constant 0 : i32
    %c0_i32_0 = arith.constant 0 : i32
    return %c0_i32, %arg1 : i32, i32
  }
  func.func @transform_2(%arg0: i32, %arg1: i32) -> (i32, i32) {
    %c0_i32 = arith.constant 0 : i32
    %c0_i32_0 = arith.constant 0 : i32
    return %c0_i32, %arg1 : i32, i32
  }
  func.func @transform_3(%arg0: i32, %arg1: i32) -> (i32, i32) {
    %c0_i32 = arith.constant 0 : i32
    return %arg0, %arg1 : i32, i32
  }
}

</mosaic_0001>

<bundles_post_ra>
// kernel: tpu_custom_call.1
= control target key start
LH: loop header
LB: loop body
LE: loop exit
PB: predicated region body
PF: predicated region fallthrough
CT: control target
= control target key end

     0   :  { %8 = vsyncpa [#allocation3], 0  ;;  %s219_s0 = inlined_call_operand.hbm [shape: f32[8,32], index: 0, kind: input, shape index: {}]   ;;  %s220_s1 = inlined_call_operand.hbm [shape: f32[32,128], index: 1, kind: input, shape index: {}]   ;;  %s221_s2 = inlined_call_operand.vmem [shape: f32[1,128], index: 2, kind: input, shape index: {}]   ;;  %s222_s3 = inlined_call_operand.hbm [shape: f32[8,128], index: 3, kind: output, shape index: {}]  }
   0x1   :  { %9 = vsyncpa [#allocation6], 0 }
   0x2   :  { %10 = vsyncpa [#allocation4], 0  ;;  %s16_s14 = sshll.u32 %s219_s0, 4  ;;  %s182_s15 = smov [#allocation2]   ;;  %s17_s14 = int_to_ptr.hbm [resolvable:$true] %s16_s14 }
   0x3   :  { %s18_s16 = sshll.u32 %s182_s15, 4  ;;  %s26_s19 = sshll.u32 %s220_s1, 4  ;;  %s19_s16 = int_to_ptr.vmem [resolvable:$true] %s18_s16  ;;  %s27_s19 = int_to_ptr.hbm [resolvable:$true] %s26_s19 }
   0x4   :  { %21 = dma.hbm_to_vmem [thread:$0]  %s17_s14, 128, %s19_s16, [#allocation3]  }
   0x5   :  { %s183_s20 = smov [#allocation5]   ;;  %s184_s22 = smov 128  }
   0x6   :  { %s28_s21 = sshll.u32 %s183_s20, 4  ;;  %s185_s23 = smov 8   ;;  %s29_s21 = int_to_ptr.vmem [resolvable:$true] %s28_s21 }
   0x7   :  { %34 = dma.hbm_to_vmem [thread:$0]  %s27_s19, 512, %s29_s21, [#allocation6], %s184_s22, %s184_s22, %s185_s23  }
   0x8   :  { %176 = dma.done.wait [#allocation3], 128  }
   0x9   :  { %177 = vsyncadd [#allocation3], 4294967168 }
   0xa   :  { %178 = dma.done.wait [#allocation6], 512  }
   0xb   :  { %179 = vsyncadd [#allocation6], 4294966784  ;;  %v49_v0 = vld [vmem:[#allocation5 + $0x18] sm:$0xff]  ;;  %v48_v1 = vld [vmem:[#allocation5 + $0x10] sm:$0xff]  ;;  %vm54_vm0 = vcmask 261120   ;;  %s186_s24 = smov [#allocation7]  }
   0xc   :  { %70 = vmatpush.msra.mxu0 %v49_v0  ;;  %v47_v2 = vld [vmem:[#allocation5 + $0x8] sm:$0xff]  ;;  %v46_v3 = vld [vmem:[#allocation5] sm:$0xff]  ;;  %v45_v4 = vld [vmem:[#allocation2] sm:$0xff]  ;;  %s84_s25 = sshll.u32 %s186_s24, 4  ;;  %s86_s28 = sshll.u32 %s222_s3, 4  ;;  %s85_s25 = int_to_ptr.vmem [resolvable:$true] %s84_s25  ;;  %s87_s28 = int_to_ptr.hbm [resolvable:$true] %s86_s28 }
   0xd   :  { %v103_v5 = vld [vmem:[%s221_s2] ss:$0 sm:$0xff] }
   0xe   :  { %71 = vmatpush.msra.mxu0 %v48_v1 }
  0x10   :  { %72 = vmatpush.msra.mxu0 %v47_v2 }
  0x12   :  { %73 = vmatpush.msra.mxu0 %v46_v3 }
  0x13   :  { %97 = vmatmul.msk.f32.vlgmr.msra.gmra.mxu0 %vm54_vm0, %v45_v4 }
  0x90   :  { %v75_v6 = vpop.f32.mrf.mxu0 }
  0x91   :  { %v76_v7 = vadd.f32 %v103_v5, %v75_v6 }
  0x93   :  { %78 = vst [vmem:[#allocation7] sm:$0xff] %v76_v7 }
  0x94   :  { %89 = dma.vmem_to_hbm [thread:$0]  %s85_s25, 128, %s87_s28, [#allocation4]  }
  0x95   :  { %180 = dma.done.wait [#allocation4], 128  }
  0x96   :  { %181 = vsyncadd [#allocation4], 4294967168 }
  0x97   :  { %94 = vsyncpa [#allocation3], 1 }
  0x98   :  { %95 = vsyncpa [#allocation6], 1 }
  0x99   :  { %96 = vsyncpa [#allocation4], 1 }

</bundles_post_ra>
